<compile_context>
chip_gen: v6e
topology: v6e:2x2x1
jax: 0.10.0
libtpu: 0.0.40
codegen_flags: <defaults>
</compile_context>

<pallas_src>
import jax
import jax.numpy as jnp
import numpy as np
from jax.experimental import pallas as pl
from jax.experimental.pallas import tpu as pltpu

# Static cfg instantiation sizes.
IMG = 16            # input spatial
CIN = 4             # input channels
C1 = 8              # conv1 out channels
C2 = 16             # conv2 out channels
NCLS = 10           # classifier outputs
HP = IMG + 2        # padded spatial (pad=1)                 -> 18
S2 = IMG // 2       # conv2 output spatial (stride 2)        -> 8
ROW_IN = HP * CIN   # lanes of a padded input row            -> 72
ROW_MID = IMG * C1  # lanes of an UNpadded conv1 row         -> 128
ROW_OUT = S2 * C2   # lanes of a conv2 output row            -> 128
NPAD = 128          # lane-padded classifier width


# ----------------------------------------------------------------------------
# Fused Pallas kernel: conv1+BN+ReLU -> conv2+ReLU -> global-avg-pool -> FC
# (one grid step processes TB images; all intermediates stay in registers)
# ----------------------------------------------------------------------------
def _make_kernel(tb):
    m8 = tb * 8

    def kernel(x_ref, a1_ref, a2_ref, c_ref, o_ref):
        dot = lambda a, b: jnp.dot(a, b, preferred_element_type=jnp.float32)

        # Packed constants: rows 0..127 = fcw (pool + lane-pad folded),
        # row 128 = b1, row 129 = b2, row 130 = fcb (lane-padded).
        fcw = c_ref[0:ROW_OUT, :]                     # [128,128] f32
        b1 = c_ref[ROW_OUT:ROW_OUT + 1, :]            # [1,128]
        b2 = c_ref[ROW_OUT + 1:ROW_OUT + 2, :]        # [1,128]
        fcb = c_ref[ROW_OUT + 2:ROW_OUT + 3, :]       # [1,128]

        x = x_ref[...]                                # (tb, 2, 9, 72) f32
        xe = x[:, 0]                                  # even padded rows 0,2,...,16
        xo = x[:, 1]                                  # odd  padded rows 1,3,...,17

        def rows(v):                                  # (tb,8,72) -> (tb*8,72) bf16
            return v.reshape(m8, ROW_IN).astype(jnp.bfloat16)

        a1_0 = a1_ref[0]
        a1_1 = a1_ref[1]
        a1_2 = a1_ref[2]

        # --- conv1 (3x3, s=1, p=1) + folded BN + ReLU, split by row parity ----
        # real output rows 0,2,...,14 need padded input rows 2m, 2m+1, 2m+2
        y1_odd = (dot(rows(xe[:, 0:8]), a1_0) + dot(rows(xo[:, 0:8]), a1_1) +
                  dot(rows(xe[:, 1:9]), a1_2) + b1)
        y1_odd = jnp.maximum(y1_odd, 0.0)             # (tb*8, 128)
        # real output rows 1,3,...,15 need padded input rows 2m+1, 2m+2, 2m+3
        y1_even = (dot(rows(xo[:, 0:8]), a1_0) + dot(rows(xe[:, 1:9]), a1_1) +
                   dot(rows(xo[:, 1:9]), a1_2) + b1)
        y1_even = jnp.maximum(y1_even, 0.0)           # (tb*8, 128)

        # --- conv2 (3x3, s=2, p=1) + ReLU --------------------------------------
        # output row i reads padded conv1 rows 2i, 2i+1, 2i+2 =
        # [zero-shifted y1_even, y1_odd, y1_even]; the three taps are fused into
        # one K=384 matmul (a2_ref is the tap mats stacked along K).
        y1e3 = y1_even.reshape(tb, 8, ROW_MID)
        shifted = jnp.concatenate(
            [jnp.zeros((tb, 1, ROW_MID), jnp.float32), y1e3[:, :7, :]],
            axis=1).reshape(m8, ROW_MID)
        lhs2 = jnp.concatenate([shifted, y1_odd, y1_even],
                               axis=-1).astype(jnp.bfloat16)      # (tb*8, 384)
        y2 = jnp.maximum(dot(lhs2, a2_ref[...]) + b2, 0.0)        # (tb*8, 128)

        # --- global average pool (1/64 folded into fcw) + linear head ----------
        s = jnp.sum(y2.reshape(tb, 8, ROW_OUT), axis=1)           # (tb, 128)
        o_ref[0] = dot(s, fcw) + fcb                              # (tb, 128)

    return kernel


# ----------------------------------------------------------------------------
# Parameter-time constant folds (done once in the wrapper, tiny tensors)
# ----------------------------------------------------------------------------
def _conv_row_mats(w_oihw, *, stride, win, wout, pad_w):
    """Build A[dh] in R^[win*Cin, wout*Cout] so a conv over a (width x channel)
    flattened image row becomes  out_row = sum_dh in_row(h+dh) @ A[dh].
    Width zero-padding is baked into the band (out-of-range cols skipped)."""
    cout, cin, kh, kw = w_oihw.shape
    w_pos = np.arange(wout)
    mats = []
    for dh in range(kh):
        a = jnp.zeros((win * cin, wout * cout), jnp.float32)
        for dw in range(kw):
            w_in = stride * w_pos + dw - pad_w
            valid = (w_in >= 0) & (w_in < win)
            sel = jnp.zeros((win, wout), jnp.float32)
            sel = sel.at[w_in[valid], w_pos[valid]].set(1.0)
            a = a + jnp.kron(sel, w_oihw[:, :, dh, dw].T)
        mats.append(a)
    return jnp.stack(mats, axis=0)          # [3, win*Cin, wout*Cout]


def _choose_batch_block(batch):
    # M = TB*8 MXU rows per conv matmul; target ~128-256, but keep >= 2 grid
    # steps when the batch allows so both v7x TensorCores get a step.
    for tb in (32, 16, 8, 4, 2):
        if batch >= 2 * tb:
            return tb
    return 1


@jax.jit
def nnet_forward(x_nchw, params):
    """Matches NNet.forward_cfg for the instantiated cfg (single fused kernel)."""
    B = x_nchw.shape[0]
    TB = _choose_batch_block(B)
    G = pl.cdiv(B, TB)
    Bp = G * TB

    # --- input: NCHW -> padded NHWC rows, split by row parity, ONE tensor ------
    x = jnp.transpose(x_nchw, (0, 2, 3, 1)).astype(jnp.float32)       # (B,16,16,4)
    xp = jnp.pad(x, ((0, 0), (1, 1), (1, 1), (0, 0)))                 # (B,18,18,4)
    xq = xp.reshape(B, HP // 2, 2, ROW_IN)                            # (B,9,2,72)
    xq = jnp.transpose(xq, (0, 2, 1, 3))                              # (B,2,9,72)
    if Bp != B:
        xq = jnp.pad(xq, ((0, Bp - B), (0, 0), (0, 0), (0, 0)))

    # --- parameter-time constant folds ------------------------------------------
    scale = params["bn1_gamma"] * jax.lax.rsqrt(params["bn1_var"] + 1e-5)
    w1 = params["conv1_w"] * scale[:, None, None, None]
    b1f = (params["conv1_b"] - params["bn1_mean"]) * scale + params["bn1_beta"]

    a1 = _conv_row_mats(w1, stride=1, win=HP, wout=IMG, pad_w=0)       # (3,72,128)
    a2 = _conv_row_mats(params["conv2_w"], stride=2, win=IMG, wout=S2,
                        pad_w=1)                                       # (3,128,128)
    a1 = a1.astype(jnp.bfloat16)
    a2s = a2.reshape(3 * ROW_MID, ROW_OUT).astype(jnp.bfloat16)        # (384,128)

    b1 = jnp.tile(b1f, (IMG,))                                         # (128,)
    b2 = jnp.tile(params["conv2_b"], (S2,))                            # (128,)
    # 1/(S2*S2) of the global-avg-pool folded into the classifier weight;
    # classifier lanes padded 10 -> 128 so the output store stays lane-dense.
    fcw = jnp.kron(jnp.ones((S2, 1), jnp.float32),
                   params["fc_w"]) / float(S2 * S2)                    # (128,10)
    fcw_pad = jnp.pad(fcw, ((0, 0), (0, NPAD - NCLS)))                 # (128,128)
    fcb_pad = jnp.pad(params["fc_b"], (0, NPAD - NCLS))                # (128,)
    consts = jnp.concatenate(
        [fcw_pad, b1[None, :], b2[None, :], fcb_pad[None, :]], axis=0)  # (131,128)

    out = pl.pallas_call(
        _make_kernel(TB),
        out_shape=jax.ShapeDtypeStruct((G, TB, NPAD), jnp.float32),
        grid_spec=pltpu.PrefetchScalarGridSpec(
            num_scalar_prefetch=0,
            grid=(G,),
            in_specs=[
                pl.BlockSpec((TB, 2, HP // 2, ROW_IN), lambda b: (b, 0, 0, 0)),  # x
                pl.BlockSpec((3, ROW_IN, ROW_MID), lambda b: (0, 0, 0)),         # a1
                pl.BlockSpec((3 * ROW_MID, ROW_OUT), lambda b: (0, 0)),          # a2
                pl.BlockSpec((ROW_OUT + 3, NPAD), lambda b: (0, 0)),             # consts
            ],
            out_specs=pl.BlockSpec((1, TB, NPAD), lambda b: (b, 0, 0)),
        ),
        compiler_params=pltpu.CompilerParams(
            dimension_semantics=("parallel",)),
    )(xq, a1, a2s, consts)
    return out.reshape(Bp, NPAD)[:B, :NCLS]


# ----------------------------------------------------------------------------
# Pure-JAX reference (same math, no Pallas) for a sanity check
# ----------------------------------------------------------------------------
def _im2col(x_nhwc, ksize, stride, pad):
    b, h, w, c = x_nhwc.shape
    xp = jnp.pad(x_nhwc, ((0, 0), (pad, pad), (pad, pad), (0, 0)))
    ho = (h + 2 * pad - ksize) // stride + 1
    wo = (w + 2 * pad - ksize) // stride + 1
    patches = []
    for dh in range(ksize):
        for dw in range(ksize):
            patches.append(
                xp[:, dh:dh + stride * ho:stride, dw:dw + stride * wo:stride, :])
    cols = jnp.stack(patches, axis=3)
    return cols.reshape(b * ho * wo, ksize * ksize * c), ho, wo


def _conv_w_mat(w_oihw):
    cout, cin, kh, kw = w_oihw.shape
    return jnp.transpose(w_oihw, (2, 3, 1, 0)).reshape(kh * kw * cin, cout)


def nnet_forward_ref(x_nchw, params):
    b = x_nchw.shape[0]
    x = jnp.transpose(x_nchw, (0, 2, 3, 1)).astype(jnp.float32)
    scale = params["bn1_gamma"] / jnp.sqrt(params["bn1_var"] + 1e-5)
    bias1 = (params["conv1_b"] - params["bn1_mean"]) * scale + params["bn1_beta"]
    cols, ho, wo = _im2col(x, 3, 1, 1)
    y1 = jnp.maximum(cols @ _conv_w_mat(params["conv1_w"]) * scale[None, :]
                     + bias1[None, :], 0.0).reshape(b, ho, wo, C1)
    cols2, ho2, wo2 = _im2col(y1, 3, 2, 1)
    y2 = jnp.maximum(cols2 @ _conv_w_mat(params["conv2_w"])
                     + params["conv2_b"][None, :], 0.0)
    pooled = jnp.mean(y2.reshape(b, ho2 * wo2, C2), axis=1)
    return pooled @ params["fc_w"] + params["fc_b"][None, :]


def init_params(key):
    ks = jax.random.split(key, 6)
    return {
        "conv1_w": 0.1 * jax.random.normal(ks[0], (C1, CIN, 3, 3), jnp.float32),
        "conv1_b": 0.1 * jax.random.normal(ks[1], (C1,), jnp.float32),
        "bn1_gamma": jnp.ones((C1,), jnp.float32),
        "bn1_beta": jnp.zeros((C1,), jnp.float32),
        "bn1_mean": jnp.zeros((C1,), jnp.float32),
        "bn1_var": jnp.ones((C1,), jnp.float32),
        "conv2_w": 0.1 * jax.random.normal(ks[2], (C2, C1, 3, 3), jnp.float32),
        "conv2_b": 0.1 * jax.random.normal(ks[3], (C2,), jnp.float32),
        "fc_w": 0.1 * jax.random.normal(ks[4], (C2, NCLS), jnp.float32),
        "fc_b": 0.1 * jax.random.normal(ks[5], (NCLS,), jnp.float32),
    }


if __name__ == "__main__":
    key = jax.random.PRNGKey(0)
    kx, kp = jax.random.split(key)
    params = init_params(kp)

    # batch=2: tiny demo (TB=1, grid=2).  batch=36: exercises the batch-blocked
    # path (TB=16, grid=3) including batch padding.
    for batch in (2, 36):
        x = jax.random.normal(jax.random.fold_in(kx, batch),
                              (batch, CIN, IMG, IMG), jnp.float32)   # NCHW
        out = jax.block_until_ready(nnet_forward(x, params))
        ref = jax.block_until_ready(nnet_forward_ref(x, params))
        assert out.shape == (batch, NCLS), out.shape
        assert bool(jnp.all(jnp.isfinite(out)))
        err = float(jnp.max(jnp.abs(out - ref)))
        assert bool(jnp.allclose(out, ref, rtol=2e-2, atol=2e-2)), err

    # TODO(synk): NNet is cfg-driven; only a representative conv/bn/relu + pooled
    # linear-head cfg is instantiated (NetParser, training/optimizer/checkpoint
    # and Message machinery have no Pallas equivalent and are omitted).
    print("KERNEL_OK")
</pallas_src>

<mosaic_0001>
module attributes {stable_mosaic.version = 11 : i64} {
  func.func @kernel(%arg0: i32, %arg1: memref<1x2x9x72xf32, #tpu.memory_space<vmem>>, %arg2: memref<3x72x128xbf16, #tpu.memory_space<vmem>>, %arg3: memref<384x128xbf16, #tpu.memory_space<vmem>>, %arg4: memref<131x128xf32, #tpu.memory_space<vmem>>, %arg5: memref<1x1x128xf32, #tpu.memory_space<vmem>>) attributes {dimension_semantics = [#tpu.dimension_semantics<parallel>], iteration_bounds = array<i64: 2>, scalar_prefetch = 0 : i64, scratch_operands = 0 : i64, tpu.core_type = #tpu.core_type<tc>, window_params = [{transform_indices = @transform_0, window_bounds = array<i64: 1, 2, 9, 72>}, {pipeline_mode = #tpu.pipeline_mode<synchronous>, transform_indices = @transform_1, window_bounds = array<i64: 3, 72, 128>}, {pipeline_mode = #tpu.pipeline_mode<synchronous>, transform_indices = @transform_2, window_bounds = array<i64: 384, 128>}, {pipeline_mode = #tpu.pipeline_mode<synchronous>, transform_indices = @transform_3, window_bounds = array<i64: 131, 128>}, {transform_indices = @transform_4, window_bounds = array<i64: 1, 1, 128>}]} {
    %c0 = arith.constant 0 : index
    %c0_0 = arith.constant 0 : index
    %0 = vector.load %arg4[%c0, %c0_0] : memref<131x128xf32, #tpu.memory_space<vmem>>, vector<128x128xf32>
    %c128 = arith.constant 128 : index
    %c0_1 = arith.constant 0 : index
    %1 = vector.load %arg4[%c128, %c0_1] : memref<131x128xf32, #tpu.memory_space<vmem>>, vector<1x128xf32>
    %c129 = arith.constant 129 : index
    %c0_2 = arith.constant 0 : index
    %2 = vector.load %arg4[%c129, %c0_2] : memref<131x128xf32, #tpu.memory_space<vmem>>, vector<1x128xf32>
    %c130 = arith.constant 130 : index
    %c0_3 = arith.constant 0 : index
    %3 = vector.load %arg4[%c130, %c0_3] : memref<131x128xf32, #tpu.memory_space<vmem>>, vector<1x128xf32>
    %c0_4 = arith.constant 0 : index
    %c0_5 = arith.constant 0 : index
    %c0_6 = arith.constant 0 : index
    %c0_7 = arith.constant 0 : index
    %4 = vector.load %arg1[%c0_4, %c0_5, %c0_6, %c0_7] : memref<1x2x9x72xf32, #tpu.memory_space<vmem>>, vector<1x2x9x72xf32>
    %5 = vector.extract_strided_slice %4 {offsets = [0, 0, 0, 0], sizes = [1, 1, 9, 72], strides = [1, 1, 1, 1]} : vector<1x2x9x72xf32> to vector<1x1x9x72xf32>
    %6 = vector.shape_cast %5 : vector<1x1x9x72xf32> to vector<1x9x72xf32>
    %7 = vector.extract_strided_slice %4 {offsets = [0, 1, 0, 0], sizes = [1, 1, 9, 72], strides = [1, 1, 1, 1]} : vector<1x2x9x72xf32> to vector<1x1x9x72xf32>
    %8 = vector.shape_cast %7 : vector<1x1x9x72xf32> to vector<1x9x72xf32>
    %c0_8 = arith.constant 0 : index
    %c0_9 = arith.constant 0 : index
    %c0_10 = arith.constant 0 : index
    %9 = vector.load %arg2[%c0_8, %c0_9, %c0_10] : memref<3x72x128xbf16, #tpu.memory_space<vmem>>, vector<1x72x128xbf16>
    %10 = vector.shape_cast %9 : vector<1x72x128xbf16> to vector<72x128xbf16>
    %c1 = arith.constant 1 : index
    %c0_11 = arith.constant 0 : index
    %c0_12 = arith.constant 0 : index
    %11 = vector.load %arg2[%c1, %c0_11, %c0_12] : memref<3x72x128xbf16, #tpu.memory_space<vmem>>, vector<1x72x128xbf16>
    %12 = vector.shape_cast %11 : vector<1x72x128xbf16> to vector<72x128xbf16>
    %c2 = arith.constant 2 : index
    %c0_13 = arith.constant 0 : index
    %c0_14 = arith.constant 0 : index
    %13 = vector.load %arg2[%c2, %c0_13, %c0_14] : memref<3x72x128xbf16, #tpu.memory_space<vmem>>, vector<1x72x128xbf16>
    %14 = vector.shape_cast %13 : vector<1x72x128xbf16> to vector<72x128xbf16>
    %15 = vector.extract_strided_slice %6 {offsets = [0, 0, 0], sizes = [1, 8, 72], strides = [1, 1, 1]} : vector<1x9x72xf32> to vector<1x8x72xf32>
    %16 = vector.shape_cast %15 : vector<1x8x72xf32> to vector<8x72xf32>
    %17 = arith.truncf %16 : vector<8x72xf32> to vector<8x72xbf16>
    %cst = arith.constant dense<0.000000e+00> : vector<8x128xf32>
    %18 = tpu.matmul %17, %10, %cst {dimension_numbers = #tpu.dot_dimension_numbers<[1], [0], [0], [1], [0, 0, 1, 1], [], []>} : vector<8x72xbf16>, vector<72x128xbf16>, vector<8x128xf32> -> vector<8x128xf32>
    %19 = vector.extract_strided_slice %8 {offsets = [0, 0, 0], sizes = [1, 8, 72], strides = [1, 1, 1]} : vector<1x9x72xf32> to vector<1x8x72xf32>
    %20 = vector.shape_cast %19 : vector<1x8x72xf32> to vector<8x72xf32>
    %21 = arith.truncf %20 : vector<8x72xf32> to vector<8x72xbf16>
    %cst_15 = arith.constant dense<0.000000e+00> : vector<8x128xf32>
    %22 = tpu.matmul %21, %12, %cst_15 {dimension_numbers = #tpu.dot_dimension_numbers<[1], [0], [0], [1], [0, 0, 1, 1], [], []>} : vector<8x72xbf16>, vector<72x128xbf16>, vector<8x128xf32> -> vector<8x128xf32>
    %23 = arith.addf %18, %22 : vector<8x128xf32>
    %24 = vector.extract_strided_slice %6 {offsets = [0, 1, 0], sizes = [1, 8, 72], strides = [1, 1, 1]} : vector<1x9x72xf32> to vector<1x8x72xf32>
    %25 = vector.shape_cast %24 : vector<1x8x72xf32> to vector<8x72xf32>
    %26 = arith.truncf %25 : vector<8x72xf32> to vector<8x72xbf16>
    %cst_16 = arith.constant dense<0.000000e+00> : vector<8x128xf32>
    %27 = tpu.matmul %26, %14, %cst_16 {dimension_numbers = #tpu.dot_dimension_numbers<[1], [0], [0], [1], [0, 0, 1, 1], [], []>} : vector<8x72xbf16>, vector<72x128xbf16>, vector<8x128xf32> -> vector<8x128xf32>
    %28 = arith.addf %23, %27 : vector<8x128xf32>
    %29 = vector.broadcast %1 : vector<1x128xf32> to vector<8x128xf32>
    %30 = arith.addf %28, %29 : vector<8x128xf32>
    %cst_17 = arith.constant 0.000000e+00 : f32
    %31 = vector.broadcast %cst_17 : f32 to vector<8x128xf32>
    %32 = arith.maximumf %30, %31 : vector<8x128xf32>
    %33 = vector.extract_strided_slice %8 {offsets = [0, 0, 0], sizes = [1, 8, 72], strides = [1, 1, 1]} : vector<1x9x72xf32> to vector<1x8x72xf32>
    %34 = vector.shape_cast %33 : vector<1x8x72xf32> to vector<8x72xf32>
    %35 = arith.truncf %34 : vector<8x72xf32> to vector<8x72xbf16>
    %cst_18 = arith.constant dense<0.000000e+00> : vector<8x128xf32>
    %36 = tpu.matmul %35, %10, %cst_18 {dimension_numbers = #tpu.dot_dimension_numbers<[1], [0], [0], [1], [0, 0, 1, 1], [], []>} : vector<8x72xbf16>, vector<72x128xbf16>, vector<8x128xf32> -> vector<8x128xf32>
    %37 = vector.extract_strided_slice %6 {offsets = [0, 1, 0], sizes = [1, 8, 72], strides = [1, 1, 1]} : vector<1x9x72xf32> to vector<1x8x72xf32>
    %38 = vector.shape_cast %37 : vector<1x8x72xf32> to vector<8x72xf32>
    %39 = arith.truncf %38 : vector<8x72xf32> to vector<8x72xbf16>
    %cst_19 = arith.constant dense<0.000000e+00> : vector<8x128xf32>
    %40 = tpu.matmul %39, %12, %cst_19 {dimension_numbers = #tpu.dot_dimension_numbers<[1], [0], [0], [1], [0, 0, 1, 1], [], []>} : vector<8x72xbf16>, vector<72x128xbf16>, vector<8x128xf32> -> vector<8x128xf32>
    %41 = arith.addf %36, %40 : vector<8x128xf32>
    %42 = vector.extract_strided_slice %8 {offsets = [0, 1, 0], sizes = [1, 8, 72], strides = [1, 1, 1]} : vector<1x9x72xf32> to vector<1x8x72xf32>
    %43 = vector.shape_cast %42 : vector<1x8x72xf32> to vector<8x72xf32>
    %44 = arith.truncf %43 : vector<8x72xf32> to vector<8x72xbf16>
    %cst_20 = arith.constant dense<0.000000e+00> : vector<8x128xf32>
    %45 = tpu.matmul %44, %14, %cst_20 {dimension_numbers = #tpu.dot_dimension_numbers<[1], [0], [0], [1], [0, 0, 1, 1], [], []>} : vector<8x72xbf16>, vector<72x128xbf16>, vector<8x128xf32> -> vector<8x128xf32>
    %46 = arith.addf %41, %45 : vector<8x128xf32>
    %47 = vector.broadcast %1 : vector<1x128xf32> to vector<8x128xf32>
    %48 = arith.addf %46, %47 : vector<8x128xf32>
    %cst_21 = arith.constant 0.000000e+00 : f32
    %49 = vector.broadcast %cst_21 : f32 to vector<8x128xf32>
    %50 = arith.maximumf %48, %49 : vector<8x128xf32>
    %51 = vector.shape_cast %50 : vector<8x128xf32> to vector<1x8x128xf32>
    %cst_22 = arith.constant 0.000000e+00 : f32
    %52 = vector.broadcast %cst_22 : f32 to vector<1x1x128xf32>
    %53 = vector.extract_strided_slice %51 {offsets = [0, 0, 0], sizes = [1, 7, 128], strides = [1, 1, 1]} : vector<1x8x128xf32> to vector<1x7x128xf32>
    %54 = tpu.concatenate %52, %53 in 1 : vector<1x1x128xf32>, vector<1x7x128xf32> -> vector<1x8x128xf32>
    %55 = vector.shape_cast %54 : vector<1x8x128xf32> to vector<8x128xf32>
    %56 = tpu.concatenate %55, %32, %50 in 1 : vector<8x128xf32>, vector<8x128xf32>, vector<8x128xf32> -> vector<8x384xf32>
    %57 = arith.truncf %56 : vector<8x384xf32> to vector<8x384xbf16>
    %c0_23 = arith.constant 0 : index
    %c0_24 = arith.constant 0 : index
    %58 = vector.load %arg3[%c0_23, %c0_24] : memref<384x128xbf16, #tpu.memory_space<vmem>>, vector<384x128xbf16>
    %cst_25 = arith.constant dense<0.000000e+00> : vector<8x128xf32>
    %59 = tpu.matmul %57, %58, %cst_25 {dimension_numbers = #tpu.dot_dimension_numbers<[1], [0], [0], [1], [0, 0, 1, 1], [], []>} : vector<8x384xbf16>, vector<384x128xbf16>, vector<8x128xf32> -> vector<8x128xf32>
    %60 = vector.broadcast %2 : vector<1x128xf32> to vector<8x128xf32>
    %61 = arith.addf %59, %60 : vector<8x128xf32>
    %cst_26 = arith.constant 0.000000e+00 : f32
    %62 = vector.broadcast %cst_26 : f32 to vector<8x128xf32>
    %63 = arith.maximumf %61, %62 : vector<8x128xf32>
    %64 = vector.shape_cast %63 : vector<8x128xf32> to vector<1x8x128xf32>
    %cst_27 = arith.constant dense<0.000000e+00> : vector<1x128xf32>
    %65 = vector.multi_reduction <add>, %64, %cst_27 [1] : vector<1x8x128xf32> to vector<1x128xf32>
    %cst_28 = arith.constant dense<0.000000e+00> : vector<1x128xf32>
    %66 = tpu.matmul %65, %0, %cst_28 {dimension_numbers = #tpu.dot_dimension_numbers<[1], [0], [0], [1], [0, 0, 1, 1], [], []>} : vector<1x128xf32>, vector<128x128xf32>, vector<1x128xf32> -> vector<1x128xf32>
    %67 = arith.addf %66, %3 : vector<1x128xf32>
    %c0_29 = arith.constant 0 : index
    %c0_30 = arith.constant 0 : index
    %c0_31 = arith.constant 0 : index
    %68 = vector.load %arg5[%c0_29, %c0_30, %c0_31] : memref<1x1x128xf32, #tpu.memory_space<vmem>>, vector<1x1x128xf32>
    %69 = vector.shape_cast %68 : vector<1x1x128xf32> to vector<1x128xf32>
    %70 = vector.shape_cast %67 : vector<1x128xf32> to vector<1x1x128xf32>
    tpu.vector_store %arg5[%c0_29, %c0_30, %c0_31], %70 {strides = array<i32>} : memref<1x1x128xf32, #tpu.memory_space<vmem>>, vector<1x1x128xf32>,
    return
  }
  func.func @transform_0(%arg0: i32) -> (i32, i32, i32, i32) {
    %c0_i32 = arith.constant 0 : i32
    %c0_i32_0 = arith.constant 0 : i32
    %c0_i32_1 = arith.constant 0 : i32
    %c0_i32_2 = arith.constant 0 : i32
    return %arg0, %c0_i32, %c0_i32_0, %c0_i32_1 : i32, i32, i32, i32
  }
  func.func @transform_1(%arg0: i32) -> (i32, i32, i32) {
    %c0_i32 = arith.constant 0 : i32
    %c0_i32_0 = arith.constant 0 : i32
    %c0_i32_1 = arith.constant 0 : i32
    %c0_i32_2 = arith.constant 0 : i32
    return %c0_i32, %c0_i32_0, %c0_i32_1 : i32, i32, i32
  }
  func.func @transform_2(%arg0: i32) -> (i32, i32) {
    %c0_i32 = arith.constant 0 : i32
    %c0_i32_0 = arith.constant 0 : i32
    %c0_i32_1 = arith.constant 0 : i32
    return %c0_i32, %c0_i32_0 : i32, i32
  }
  func.func @transform_3(%arg0: i32) -> (i32, i32) {
    %c0_i32 = arith.constant 0 : i32
    %c0_i32_0 = arith.constant 0 : i32
    %c0_i32_1 = arith.constant 0 : i32
    return %c0_i32, %c0_i32_0 : i32, i32
  }
  func.func @transform_4(%arg0: i32) -> (i32, i32, i32) {
    %c0_i32 = arith.constant 0 : i32
    %c0_i32_0 = arith.constant 0 : i32
    %c0_i32_1 = arith.constant 0 : i32
    return %arg0, %c0_i32, %c0_i32_0 : i32, i32, i32
  }
}

</mosaic_0001>

<bundles_post_ra>
// kernel: tile.17
= control target key start
LH: loop header
LB: loop body
LE: loop exit
PB: predicated region body
PF: predicated region fallthrough
CT: control target
= control target key end

     0   :  { %s22_s0 = inlined_call_operand.vmem [shape: f32[16], index: 0, kind: input, shape index: {}]   ;;  %s23_s1 = inlined_call_operand.vmem [shape: f32[8,16], index: 1, kind: output, shape index: {}]  }
   0x1   :  { %v4_v0 = vld [vmem:[%s22_s0] ss:$0 sm:$0xff] }
   0x2   :  { %5 = vst [vmem:[%s23_s1] sm:$0xff] %v4_v0 }

// kernel: tile.19
= control target key start
LH: loop header
LB: loop body
LE: loop exit
PB: predicated region body
PF: predicated region fallthrough
CT: control target
= control target key end

     0   :  { %s69_s10 = smov 112   ;;  %s70_s11 = smov 80   ;;  %vm3_vm0 = vcmask 130048   ;;  %vm9_vm1 = vcmask 1048448   ;;  %vm15_vm2 = vcmask 917248   ;;  %vm21_vm3 = vcmask 786048   ;;  %s113_s0 = inlined_call_operand.vmem [shape: f32[8,16], index: 0, kind: input, shape index: {}]   ;;  %s114_s1 = inlined_call_operand.vmem [shape: f32[1,128], index: 1, kind: output, shape index: {}]  }
   0x1   :  { %v55_v0 = vld [vmem:[%s113_s0 + $0x7] sm:$0x1]   ;;  %v57_v1 = vld [vmem:[%s113_s0 + $0x5] sm:$0x1]   ;;  %v56_v2 = vld [vmem:[%s113_s0 + $0x6] sm:$0x1]  }
   0x2   :  { %7 = vrot.lane.b32.xlu0 %v55_v0, %s69_s10  ;;  %19 = vrot.lane.b32.xlu1 %v57_v1, %s70_s11  ;;  %v58_v3 = vld [vmem:[%s113_s0 + $0x4] sm:$0x1]   ;;  %v2_v4 = vld [vmem:[%s113_s0] sm:$0x1]   ;;  %s71_s18 = smov 96   ;;  %s72_s19 = smov 64  }
   0x3   :  { %4 = vst.msk [vmem:[#allocation0] sm:$0x1] %vm3_vm0, %v2_v4   ;;  %v59_v5 = vld [vmem:[%s113_s0 + $0x3] sm:$0x1]   ;;  %v60_v6 = vld [vmem:[%s113_s0 + $0x2] sm:$0x1]  }
   0x4   :  { %s73_s24 = smov 48   ;;  %s74_s25 = smov 32   ;;  %v61_v7 = vld [vmem:[%s113_s0 + $0x1] sm:$0x1]   ;;  %vm27_vm4 = vcmask 654848   ;;  %vm33_vm5 = vcmask 523648  }
   0x5   :  { %s75_s0 = smov 16   ;;  %vm39_vm6 = vcmask 392448   ;;  %vm45_vm7 = vcmask 261248  }
   0x6   :  { %13 = vrot.lane.b32.xlu0 %v56_v2, %s71_s18  ;;  %25 = vrot.lane.b32.xlu1 %v58_v3, %s72_s19 }
   0xa   :  { %31 = vrot.lane.b32.xlu0 %v59_v5, %s73_s24  ;;  %37 = vrot.lane.b32.xlu1 %v60_v6, %s74_s25 }
   0xe   :  { %43 = vrot.lane.b32.xlu0 %v61_v7, %s75_s0 }
  0x74   :  { %v8_v8 = vpop.permute.xlu0 %7   ;;  %v20_v9 = vpop.permute.xlu1 %19  }
  0x75   :  { %10 = vst.msk [vmem:[#allocation0] sm:$0x1] %vm9_vm1, %v8_v8  }
  0x78   :  { %v14_v10 = vpop.permute.xlu0 %13   ;;  %v26_v11 = vpop.permute.xlu1 %25  }
  0x79   :  { %16 = vst.msk [vmem:[#allocation0] sm:$0x1] %vm15_vm2, %v14_v10  }
  0x7a   :  { %22 = vst.msk [vmem:[#allocation0] sm:$0x1] %vm21_vm3, %v20_v9  }
  0x7b   :  { %28 = vst.msk [vmem:[#allocation0] sm:$0x1] %vm27_vm4, %v26_v11  }
  0x7c   :  { %v32_v12 = vpop.permute.xlu0 %31   ;;  %v38_v13 = vpop.permute.xlu1 %37  }
  0x7d   :  { %34 = vst.msk [vmem:[#allocation0] sm:$0x1] %vm33_vm5, %v32_v12  }
  0x7e   :  { %40 = vst.msk [vmem:[#allocation0] sm:$0x1] %vm39_vm6, %v38_v13  }
  0x80   :  { %v44_v14 = vpop.permute.xlu0 %43  }
  0x81   :  { %46 = vst.msk [vmem:[#allocation0] sm:$0x1] %vm45_vm7, %v44_v14  }
  0x88   :  { %v51_v15 = vld [vmem:[#allocation0] sm:$0x1] }
  0x89   :  { %54 = vst [vmem:[%s114_s1] sm:$0x1] %v51_v15 }

// kernel: tile.13
= control target key start
LH: loop header
LB: loop body
LE: loop exit
PB: predicated region body
PF: predicated region fallthrough
CT: control target
= control target key end

     0   :  { %s28_s0 = inlined_call_operand.vmem [shape: f32[8], index: 0, kind: input, shape index: {}]   ;;  %s29_s1 = inlined_call_operand.vmem [shape: f32[16,8], index: 1, kind: output, shape index: {}]  }
   0x1   :  { %v4_v0 = vld [vmem:[%s28_s0] ss:$0 sm:$0xff] }
   0x2   :  { %5 = vst [vmem:[%s29_s1] sm:$0xff] %v4_v0  ;;  %8 = vst [vmem:[%s29_s1 + $0x8] sm:$0xff] %v4_v0 }

// kernel: tile.18
= control target key start
LH: loop header
LB: loop body
LE: loop exit
PB: predicated region body
PF: predicated region fallthrough
CT: control target
= control target key end

     0   :  { %s133_s10 = smov 120   ;;  %s134_s11 = smov 104   ;;  %vm3_vm0 = vcmask 64512   ;;  %vm9_vm1 = vcmask 1048512   ;;  %vm15_vm2 = vcmask 982912   ;;  %vm21_vm3 = vcmask 917312   ;;  %s209_s0 = inlined_call_operand.vmem [shape: f32[16,8], index: 0, kind: input, shape index: {}]   ;;  %s210_s1 = inlined_call_operand.vmem [shape: f32[1,128], index: 1, kind: output, shape index: {}]  }
   0x1   :  { %v103_v0 = vld [vmem:[%s209_s0 + $0xf] sm:$0x1]   ;;  %v105_v1 = vld [vmem:[%s209_s0 + $0xd] sm:$0x1]   ;;  %v104_v2 = vld [vmem:[%s209_s0 + $0xe] sm:$0x1]  }
   0x2   :  { %7 = vrot.lane.b32.xlu0 %v103_v0, %s133_s10  ;;  %19 = vrot.lane.b32.xlu1 %v105_v1, %s134_s11  ;;  %v106_v3 = vld [vmem:[%s209_s0 + $0xc] sm:$0x1]   ;;  %s135_s16 = smov 112   ;;  %s136_s17 = smov 96   ;;  %v107_v4 = vld [vmem:[%s209_s0 + $0xb] sm:$0x1]  }
   0x3   :  { %v108_v5 = vld [vmem:[%s209_s0 + $0xa] sm:$0x1]   ;;  %v2_v6 = vld [vmem:[%s209_s0] sm:$0x1]   ;;  %s137_s24 = smov 88   ;;  %s138_s25 = smov 80  }
   0x4   :  { %4 = vst.msk [vmem:[#allocation0] sm:$0x1] %vm3_vm0, %v2_v6   ;;  %v109_v7 = vld [vmem:[%s209_s0 + $0x9] sm:$0x1]   ;;  %v110_v8 = vld [vmem:[%s209_s0 + $0x8] sm:$0x1]  }
   0x5   :  { %s139_s30 = smov 72   ;;  %s140_s2 = smov 64   ;;  %v111_v9 = vld [vmem:[%s209_s0 + $0x7] sm:$0x1]   ;;  %v112_v10 = vld [vmem:[%s209_s0 + $0x6] sm:$0x1]  }
   0x6   :  { %13 = vrot.lane.b32.xlu0 %v104_v2, %s135_s16  ;;  %25 = vrot.lane.b32.xlu1 %v106_v3, %s136_s17  ;;  %s141_s7 = smov 56   ;;  %s142_s8 = smov 48   ;;  %v113_v11 = vld [vmem:[%s209_s0 + $0x5] sm:$0x1]   ;;  %v114_v12 = vld [vmem:[%s209_s0 + $0x4] sm:$0x1]  }
   0x7   :  { %s143_s13 = smov 40   ;;  %s144_s14 = smov 32   ;;  %v115_v13 = vld [vmem:[%s209_s0 + $0x3] sm:$0x1]   ;;  %v116_v14 = vld [vmem:[%s209_s0 + $0x2] sm:$0x1]  }
   0x8   :  { %s145_s19 = smov 24   ;;  %s146_s20 = smov 16   ;;  %v117_v15 = vld [vmem:[%s209_s0 + $0x1] sm:$0x1]   ;;  %vm27_vm4 = vcmask 851712   ;;  %vm33_vm5 = vcmask 786112  }
   0x9   :  { %s147_s0 = smov 8   ;;  %vm39_vm6 = vcmask 720512   ;;  %vm45_vm7 = vcmask 654912   ;;  %vm51_vm8 = vcmask 589312   ;;  %vm57_vm9 = vcmask 523712  }
   0xa   :  { %31 = vrot.lane.b32.xlu0 %v107_v4, %s137_s24  ;;  %37 = vrot.lane.b32.xlu1 %v108_v5, %s138_s25  ;;  %vm63_vm10 = vcmask 458112   ;;  %vm69_vm11 = vcmask 392512   ;;  %vm75_vm12 = vcmask 326912   ;;  %vm81_vm13 = vcmask 261312  }
   0xb   :  { %vm87_vm14 = vcmask 195712   ;;  %vm93_vm15 = vcmask 130112  }
   0xe   :  { %43 = vrot.lane.b32.xlu0 %v109_v7, %s139_s30  ;;  %49 = vrot.lane.b32.xlu1 %v110_v8, %s140_s2 }
  0x12   :  { %55 = vrot.lane.b32.xlu0 %v111_v9, %s141_s7  ;;  %61 = vrot.lane.b32.xlu1 %v112_v10, %s142_s8 }
  0x16   :  { %67 = vrot.lane.b32.xlu0 %v113_v11, %s143_s13  ;;  %73 = vrot.lane.b32.xlu1 %v114_v12, %s144_s14 }
  0x1a   :  { %79 = vrot.lane.b32.xlu0 %v115_v13, %s145_s19  ;;  %85 = vrot.lane.b32.xlu1 %v116_v14, %s146_s20 }
  0x1e   :  { %91 = vrot.lane.b32.xlu0 %v117_v15, %s147_s0 }
  0x74   :  { %v8_v16 = vpop.permute.xlu0 %7   ;;  %v20_v17 = vpop.permute.xlu1 %19  }
  0x75   :  { %10 = vst.msk [vmem:[#allocation0] sm:$0x1] %vm9_vm1, %v8_v16  }
  0x78   :  { %v14_v18 = vpop.permute.xlu0 %13   ;;  %v26_v19 = vpop.permute.xlu1 %25  }
  0x79   :  { %16 = vst.msk [vmem:[#allocation0] sm:$0x1] %vm15_vm2, %v14_v18  }
  0x7a   :  { %22 = vst.msk [vmem:[#allocation0] sm:$0x1] %vm21_vm3, %v20_v17  }
  0x7b   :  { %28 = vst.msk [vmem:[#allocation0] sm:$0x1] %vm27_vm4, %v26_v19  }
  0x7c   :  { %v32_v20 = vpop.permute.xlu0 %31   ;;  %v38_v21 = vpop.permute.xlu1 %37  }
  0x7d   :  { %34 = vst.msk [vmem:[#allocation0] sm:$0x1] %vm33_vm5, %v32_v20  }
  0x7e   :  { %40 = vst.msk [vmem:[#allocation0] sm:$0x1] %vm39_vm6, %v38_v21  }
  0x80   :  { %v44_v22 = vpop.permute.xlu0 %43   ;;  %v50_v23 = vpop.permute.xlu1 %49  }
  0x81   :  { %46 = vst.msk [vmem:[#allocation0] sm:$0x1] %vm45_vm7, %v44_v22  }
  0x82   :  { %52 = vst.msk [vmem:[#allocation0] sm:$0x1] %vm51_vm8, %v50_v23  }
  0x84   :  { %v56_v24 = vpop.permute.xlu0 %55   ;;  %v62_v25 = vpop.permute.xlu1 %61  }
  0x85   :  { %58 = vst.msk [vmem:[#allocation0] sm:$0x1] %vm57_vm9, %v56_v24  }
  0x86   :  { %64 = vst.msk [vmem:[#allocation0] sm:$0x1] %vm63_vm10, %v62_v25  }
  0x88   :  { %v68_v26 = vpop.permute.xlu0 %67   ;;  %v74_v27 = vpop.permute.xlu1 %73  }
  0x89   :  { %70 = vst.msk [vmem:[#allocation0] sm:$0x1] %vm69_vm11, %v68_v26  }
  0x8a   :  { %76 = vst.msk [vmem:[#allocation0] sm:$0x1] %vm75_vm12, %v74_v27  }
  0x8c   :  { %v80_v28 = vpop.permute.xlu0 %79   ;;  %v86_v29 = vpop.permute.xlu1 %85  }
  0x8d   :  { %82 = vst.msk [vmem:[#allocation0] sm:$0x1] %vm81_vm13, %v80_v28  }
  0x8e   :  { %88 = vst.msk [vmem:[#allocation0] sm:$0x1] %vm87_vm14, %v86_v29  }
  0x90   :  { %v92_v30 = vpop.permute.xlu0 %91  }
  0x91   :  { %94 = vst.msk [vmem:[#allocation0] sm:$0x1] %vm93_vm15, %v92_v30  }
  0x98   :  { %v99_v31 = vld [vmem:[#allocation0] sm:$0x1] }
  0x99   :  { %102 = vst [vmem:[%s210_s1] sm:$0x1] %v99_v31 }

// kernel: nnet_forward.1
= control target key start
LH: loop header
LB: loop body
LE: loop exit
PB: predicated region body
PF: predicated region fallthrough
CT: control target
= control target key end

     0   :  { %9 = vsyncpa [#allocation3], 0  ;;  %s1920_s0 = inlined_call_operand.vmem [shape: f32[2,2,9,72], index: 0, kind: input, shape index: {}]   ;;  %s1921_s1 = inlined_call_operand.vmem [shape: bf16[3,72,128], index: 1, kind: input, shape index: {}]   ;;  %s1922_s2 = inlined_call_operand.vmem [shape: bf16[384,128], index: 2, kind: input, shape index: {}]   ;;  %s1923_s3 = inlined_call_operand.vmem [shape: f32[131,128], index: 3, kind: input, shape index: {}]   ;;  %s1924_s4 = inlined_call_operand.hbm [shape: f32[2,1,128], index: 4, kind: output, shape index: {}]  }
   0x1   :  { %11 = vsyncpa [#allocation3 + $0x1], 0  ;;  %s1523_s15 = smov 0   ;;  %s1525_s16 = smov 0  }
   0x2   :  { %s1527_s17 = smov 0   ;;  %s1529_s18 = smov 0  }
   0x3 LB: > { %s1544_s19 = sadd.s32 4294967295, %s1493_s18   ;;  %s1050_s20 = sadd.s32 4294967294, %s1493_s18   ;;  %s1493_s18 = sphi %s1529_s18, %s1930_s18   ;;  %s1489_s17 = sphi %s1527_s17, %s1929_s17   ;;  %s1485_s16 = sphi %s1525_s16, %s1928_s16   ;;  %s1481_s15 = sphi %s1523_s15, %s1927_s15  }
   0x4   : > { %s1548_s21 = sadd.s32 1, %s1493_s18   ;;  %s113_s22 = sadd.s32 1, %s1489_s17 }
   0x5   : > { %s110_s23 = ssub.s32 %s1493_s18, %s1548_s21  ;;  %p123_p0 = scmp.ne.s32.totalorder %s1489_s17, %s1485_s16 }
   0x6   : > { %p111_p1 = scmp.eq.s32.totalorder %s110_s23, 0  ;;  %p124_p2 = scmp.eq.s32.totalorder %s1544_s19, 1 }
   0x7   : > { %p129_p3 = scmp.ne.s32.totalorder %s1485_s16, %s1481_s15  ;;  %p130_p4 = scmp.eq.s32.totalorder %s1050_s20, 1 }
   0x8   : > { %s1559_s24 = scalar_select %p111_p1, %s1489_s17, %s113_s22  }
   0x9   : > { %p1561_p5 = por %p124_p2, %p123_p0  ;;  %p1565_p6 = por %p130_p4, %p129_p3 }
   0xa   : > { %p1053_p7 = scmp.ge.s32.totalorder %s1493_s18, 1  ;;  %p165_p8 = scmp.lt.s32.totalorder %s1493_s18, 3 }
   0xc   : > { %p166_p9 = pnand %p1053_p7, %p165_p8 }
   0xd   : > { %p190_p10 = scmp.lt.s32.totalorder (!%p166_p9), %s1544_s19, 1  ;;  %s188_s28 = sand.u32 (!%p166_p9), 1, %s1485_s16  }
   0xe   : > { %169 = sbr.rel (%p166_p9) target bundleno = 727 (0x2d7), region = 36  ;;  %s1126_s30 = sshll.u32 (!%p166_p9), %s1544_s19, 4 }
   0xf   : > { %s1885_s9 = scalar_lea.hbm (!%p166_p9), %s1924_s4, %s1126_s30  ;;  %s1497_s12 = smov (!%p166_p9), [#allocation2]  }
  0x13   : > { %v1394_v0 = vld [vmem:[%s1921_s1 + $0x44] ss:$0 sps:$4 sm:$0xff]   ;;  %vm281_vm0 = vcmask 1043456   ;;  %v1495_v1 = vmov 0.0   ;;  %vm1496_vm1 = vmmov 0   ;;  %v1587_v3 = vld [vmem:[%s1921_s1 + $0x3c] sm:$0xff]  }
  0x14   : > { %1214 = vmatprep.subr.bf16.mxu1 %v1495_v1  ;;  %1242 = vmatprep.subr.bf16.mxu0 %v1495_v1  ;;  %v1577_v2 = vsel %vm281_vm0, %v1394_v0, 0  ;;  %s191_s5 = scalar_select %p190_p10, %s1544_s19, 1  ;;  %v1400_v4 = vld [vmem:[%s1921_s1 + $0x68] ss:$0 sps:$4 sm:$0xff]   ;;  %v1599_v5 = vld [vmem:[%s1921_s1 + $0x34] sm:$0xff]   ;;  %v1609_v7 = vld [vmem:[%s1921_s1 + $0x60] sm:$0xff]  }
  0x15   : > { %1224 = vmatprep.mubr.msk.bf16.mxu1 %vm1496_vm1, %v1495_v1  ;;  %1252 = vmatprep.mubr.msk.bf16.mxu0 %vm1496_vm1, %v1495_v1  ;;  %v1603_v6 = vsel %vm281_vm0, %v1400_v4, 0  ;;  %v1616_v8 = vld [vmem:[%s1921_s1 + $0x2c] sm:$0xff]   ;;  %v1399_v9 = vld [vmem:[%s1921_s1 + $0x20] ss:$0 sps:$4 sm:$0xff]   ;;  %v1630_v10 = vld [vmem:[%s1921_s1 + $0x58] sm:$0xff]   ;;  %vm277_vm2 = vcmask 588800  }
  0x16   : > { %1215 = vmatpush3.bf16.msra.mxu1 %v1577_v2  ;;  %s1129_s10 = sshll.u32 %s191_s5, 5  ;;  %1243 = vmatpush3.bf16.msra.mxu0 %v1603_v6  ;;  %v1635_v11 = vld [vmem:[%s1921_s1 + $0x24] sm:$0xff]   ;;  %v1646_v13 = vld [vmem:[%s1921_s1 + $0x50] sm:$0xff]   ;;  %v356_v18 = vsel %vm281_vm0, %v1399_v9, 0  ;;  %v1401_v23 = vld [vmem:[%s1921_s1 + $0x18] sm:$0xff]   ;;  %vm623_vm3 = vcmask 1040384  }
  0x17   : > { %1216 = vmatprep.subr.bf16.mxu1 %v1495_v1  ;;  %1244 = vmatprep.subr.bf16.mxu0 %v1495_v1  ;;  %s1621_s23 = scalar_lea.vmem %s1920_s0, %s1129_s10  ;;  %v1660_v20 = vld [vmem:[%s1921_s1 + $0x48] sm:$0xff]   ;;  %v1403_v25 = vld [vmem:[%s1921_s1 + $0x10] sm:$0xff]   ;;  %v1407_v27 = vld [vmem:[%s1921_s1] sm:$0xff]   ;;  %s189_s5 = scalar_lea.vmem [#allocation2], %s188_s28 }
  0x18   : > { %v1639_v12 = vld [vmem:[%s1621_s23 + $0x10] sm:$0xff]  ;;  %v215_v14 = vld [vmem:[%s1621_s23] sm:$0xff]  ;;  %v216_v15 = vld [vmem:[%s1621_s23 + $0x8] sm:$0x1]  ;;  %s995_s6 = sshll.u32 %s189_s5, 4  ;;  %s983_s10 = scalar_lea.sflag [#allocation3], %s188_s28  ;;  %s996_s6 = int_to_ptr.vmem [resolvable:$true] %s995_s6 }
  0x19   : > { %v398_v16 = vpack.c.bf16 %v216_v15, %v215_v14  ;;  %v249_v17 = vpack.c.bf16 %v1639_v12, %v1639_v12  ;;  %v1405_v26 = vld [vmem:[%s1921_s1 + $0x8] sm:$0xff]   ;;  %v248_v28 = vpack.c.bf16 %v215_v14, %v215_v14  ;;  %v218_v29 = vld [vmem:[%s1621_s23 + $0x18] sm:$0x1]  ;;  %v1412_v38 = vld [vmem:[%s1922_s2 + $0xb0] sm:$0xff]   ;;  %s1433_s11 = scalar_lea.vmem %s996_s6, 16  ;;  %s1437_s19 = sshll.u32 %s1497_s12, 4  ;;  %s1438_s19 = int_to_ptr.vmem [resolvable:$false] %s1437_s19 }
  0x1a   : > { %1217 = vmatpush3.bf16.msra.mxu1 %v1587_v3  ;;  %1245 = vmatpush3.bf16.msra.mxu0 %v1609_v7  ;;  %v566_v30 = vpack.c.bf16 %v218_v29, %v1639_v12  ;;  %v1409_v35 = vld [vmem:[%s1922_s2 + $0xb8] sm:$0xff]   ;;  %v1413_v39 = vld [vmem:[%s1922_s2 + $0x70] sm:$0xff]   ;;  %v1415_v41 = vld [vmem:[%s1922_s2 + $0xa8] sm:$0xff]   ;;  %p1434_p11 = scmp.ne.s32.totalorder %s996_s6, %s1433_s11  ;;  %s1439_s13 = scalar_lea.vmem %s1438_s19, 32 }
  0x1b   : > { %1218 = vmatprep.subr.bf16.mxu1 %v1495_v1  ;;  %1246 = vmatprep.subr.bf16.mxu0 %v1495_v1  ;;  %v402_v19 = vshll.u32 %v398_v16, 16  ;;  %v400_v21 = vshrl.u32 %v398_v16, 16  ;;  %v1410_v36 = vld [vmem:[%s1922_s2 + $0x78] sm:$0xff]   ;;  %v1414_v40 = vld [vmem:[%s1922_s2 + $0x30] sm:$0xff]   ;;  %v1416_v42 = vld [vmem:[%s1922_s2 + $0x68] sm:$0xff]   ;;  %p1440_p0 = scmp.lt.s32.totalorder %s996_s6, %s1438_s19  ;;  %p1441_p1 = scmp.lt.s32.totalorder %s1439_s13, %s1433_s11 }
  0x1c   : > { %v570_v31 = vshll.u32 %v566_v30, 16  ;;  %v568_v32 = vshrl.u32 %v566_v30, 16  ;;  %v1411_v37 = vld [vmem:[%s1922_s2 + $0x38] sm:$0xff]   ;;  %v1417_v43 = vld [vmem:[%s1922_s2 + $0x28] sm:$0xff]   ;;  %v1418_v44 = vld [vmem:[%s1922_s2 + $0xa0] sm:$0xff]   ;;  %p1435_p12 = pnand %p1434_p11, %p1561_p5 }
  0x1d   : > { %v404_v22 = vrot.slane %v402_v19, 1  ;;  %v1419_v45 = vld [vmem:[%s1922_s2 + $0x60] sm:$0xff]   ;;  %v1422_v47 = vld [vmem:[%s1922_s2 + $0x58] sm:$0xff]   ;;  %v1425_v50 = vld [vmem:[%s1922_s2 + $0x50] sm:$0xff]   ;;  %p1442_p2 = por %p1441_p1, %p1440_p0 }
  0x1e   : > { %1219 = vmatpush3.bf16.msra.mxu1 %v1599_v5  ;;  %1247 = vmatpush3.bf16.msra.mxu0 %v1630_v10  ;;  %v572_v33 = vrot.slane %v570_v31, 1  ;;  %v1420_v46 = vld [vmem:[%s1922_s2 + $0x20] sm:$0xff]   ;;  %v1421_v48 = vld [vmem:[%s1922_s2 + $0x98] sm:$0xff]   ;;  %v1424_v51 = vld [vmem:[%s1922_s2 + $0x90] sm:$0xff]   ;;  %p1436_p13 = pneg %p1435_p12 }
  0x1f   : > { %1220 = vmatprep.subr.bf16.mxu1 %v1495_v1  ;;  %1248 = vmatprep.subr.bf16.mxu0 %v1495_v1  ;;  %v405_v24 = vor.u32 %v404_v22, %v400_v21  ;;  %v1423_v49 = vld [vmem:[%s1922_s2 + $0x18] sm:$0xff]   ;;  %v1426_v52 = vld [vmem:[%s1922_s2 + $0x10] sm:$0xff]   ;;  %v1427_v53 = vld [vmem:[%s1922_s2 + $0x88] sm:$0xff]  }
  0x20   : > { %v573_v34 = vor.u32 %v572_v33, %v568_v32  ;;  %v1428_v54 = vld [vmem:[%s1922_s2 + $0x48] sm:$0xff]   ;;  %v1430_v56 = vld [vmem:[%s1922_s2 + $0x80] sm:$0xff]   ;;  %vm1121_vm4 = vmneg %vm623_vm3  ;;  %p1443_p3 = pnand %p1442_p2, %p1436_p13 }
  0x21   : > { %v1429_v55 = vld [vmem:[%s1922_s2 + $0x8] sm:$0xff]   ;;  %v1431_v57 = vld [vmem:[%s1922_s2 + $0x40] sm:$0xff]   ;;  %vm1123_vm5 = vmpackc.low %vm1121_vm4, %vm1121_vm4 }
  0x22   : > { %1221 = vmatpush3.bf16.msra.mxu1 %v1616_v8  ;;  %1249 = vmatpush3.bf16.msra.mxu0 %v1646_v13  ;;  %v1432_v58 = vld [vmem:[%s1922_s2] sm:$0xff]   ;;  %v211_v33 = vld [vmem:[%s1923_s3 + $0x78] sm:$0xff] }
  0x23   : > { %1222 = vmatprep.subr.bf16.mxu1 %v1495_v1  ;;  %1250 = vmatprep.subr.bf16.mxu0 %v1495_v1 }
  0x26   : > { %1223 = vmatpush3.bf16.msra.mxu1 %v1635_v11  ;;  %1251 = vmatpush3.bf16.msra.mxu0 %v1660_v20 }
  0x27   : > { %1228 = vmatprep.subr.bf16.mxu1 %v1495_v1  ;;  %1270 = vmatprep.subr.bf16.mxu0 %v1495_v1 }
  0x29   : > { %1225 = vmatmul.mubr.msk.bf16.vlgmr.msra.gmra.mxu1 %vm277_vm2, %v249_v17  ;;  %1253 = vmatmul.mubr.msk.bf16.vlgmr.msra.gmra.mxu0 %vm277_vm2, %v405_v24 }
  0x2a   : > { %1229 = vmatpush3.bf16.msra.mxu1 %v356_v18  ;;  %1238 = vmatprep.mubr.msk.bf16.mxu1 %vm1496_vm1, %v1495_v1 }
  0x2b   : > { %1230 = vmatprep.subr.bf16.mxu1 %v1495_v1  ;;  %1271 = vmatpush3.bf16.msra.mxu0 %v356_v18 }
  0x2c   : > { %1280 = vmatprep.mubr.msk.bf16.mxu0 %vm1496_vm1, %v1495_v1  ;;  %1272 = vmatprep.subr.bf16.mxu0 %v1495_v1 }
  0x2e   : > { %1231 = vmatpush3.bf16.msra.mxu1 %v1401_v23 }
  0x2f   : > { %1232 = vmatprep.subr.bf16.mxu1 %v1495_v1  ;;  %1273 = vmatpush3.bf16.msra.mxu0 %v1401_v23 }
  0x30   : > { %1274 = vmatprep.subr.bf16.mxu0 %v1495_v1 }
  0x32   : > { %1233 = vmatpush3.bf16.msra.mxu1 %v1403_v25 }
  0x33   : > { %1234 = vmatprep.subr.bf16.mxu1 %v1495_v1  ;;  %1275 = vmatpush3.bf16.msra.mxu0 %v1403_v25 }
  0x34   : > { %1276 = vmatprep.subr.bf16.mxu0 %v1495_v1 }
  0x36   : > { %1235 = vmatpush3.bf16.msra.mxu1 %v1405_v26 }
  0x37   : > { %1236 = vmatprep.subr.bf16.mxu1 %v1495_v1  ;;  %1277 = vmatpush3.bf16.msra.mxu0 %v1405_v26 }
  0x38   : > { %1278 = vmatprep.subr.bf16.mxu0 %v1495_v1 }
  0x3a   : > { %1237 = vmatpush3.bf16.msra.mxu1 %v1407_v27 }
  0x3b   : > { %1256 = vmatprep.subr.bf16.mxu1 %v1495_v1  ;;  %1279 = vmatpush3.bf16.msra.mxu0 %v1407_v27 }
  0x3c   : > { %1166 = vmatprep.subr.bf16.mxu0 %v1410_v36  ;;  %v208_v36 = vld [vmem:[%s1923_s3 + $0x60] sm:$0xff] }
  0x3d   : > { %1239 = vmatmul.mubr.msk.bf16.vlgmr.msra.gmra.mxu1 %vm277_vm2, %v248_v28 }
  0x3e   : > { %1257 = vmatpush3.bf16.msra.mxu1 %v1577_v2  ;;  %1266 = vmatprep.mubr.msk.bf16.mxu1 %vm1496_vm1, %v1495_v1 }
  0x3f   : > { %1258 = vmatprep.subr.bf16.mxu1 %v1495_v1  ;;  %1281 = vmatmul.mubr.msk.bf16.vlgmr.msra.gmra.mxu0 %vm277_vm2, %v249_v17 }
  0x40   : > { %1167 = vmatpush3.bf16.msra.mxu0 %v1411_v37  ;;  %v207_v37 = vld [vmem:[%s1923_s3 + $0x58] sm:$0xff] }
  0x41   : > { %1168 = vmatprep.subr.bf16.mxu0 %v1413_v39  ;;  %v205_v39 = vld [vmem:[%s1923_s3 + $0x48] sm:$0xff] }
  0x42   : > { %1259 = vmatpush3.bf16.msra.mxu1 %v1587_v3 }
  0x43   : > { %1260 = vmatprep.subr.bf16.mxu1 %v1495_v1 }
  0x44   : > { %1169 = vmatpush3.bf16.msra.mxu0 %v1414_v40  ;;  %v204_v40 = vld [vmem:[%s1923_s3 + $0x40] sm:$0xff] }
  0x45   : > { %1170 = vmatprep.subr.bf16.mxu0 %v1416_v42  ;;  %v202_v42 = vld [vmem:[%s1923_s3 + $0x30] sm:$0xff] }
  0x46   : > { %1261 = vmatpush3.bf16.msra.mxu1 %v1599_v5 }
  0x47   : > { %1262 = vmatprep.subr.bf16.mxu1 %v1495_v1 }
  0x48   : > { %1171 = vmatpush3.bf16.msra.mxu0 %v1417_v43  ;;  %v201_v43 = vld [vmem:[%s1923_s3 + $0x28] sm:$0xff] }
  0x49   : > { %1172 = vmatprep.subr.bf16.mxu0 %v1419_v45  ;;  %v199_v45 = vld [vmem:[%s1923_s3 + $0x18] sm:$0xff] }
  0x4a   : > { %1263 = vmatpush3.bf16.msra.mxu1 %v1616_v8 }
  0x4b   : > { %1264 = vmatprep.subr.bf16.mxu1 %v1495_v1 }
  0x4c   : > { %1173 = vmatpush3.bf16.msra.mxu0 %v1420_v46  ;;  %v198_v46 = vld [vmem:[%s1923_s3 + $0x10] sm:$0xff] }
  0x4d   : > { %1174 = vmatprep.subr.bf16.mxu0 %v1422_v47  ;;  %v197_v47 = vld [vmem:[%s1923_s3 + $0x8] sm:$0xff] }
  0x4e   : > { %1265 = vmatpush3.bf16.msra.mxu1 %v1635_v11 }
  0x4f   : > { %1284 = vmatprep.subr.bf16.mxu1 %v1495_v1 }
  0x50   : > { %1175 = vmatpush3.bf16.msra.mxu0 %v1423_v49 }
  0x51   : > { %1267 = vmatmul.mubr.msk.bf16.vlgmr.msra.gmra.mxu1 %vm277_vm2, %v405_v24  ;;  %1176 = vmatprep.subr.bf16.mxu0 %v1425_v50 }
  0x52   : > { %1285 = vmatpush3.bf16.msra.mxu1 %v1603_v6  ;;  %1294 = vmatprep.mubr.msk.bf16.mxu1 %vm1496_vm1, %v1495_v1 }
  0x53   : > { %1286 = vmatprep.subr.bf16.mxu1 %v1495_v1 }
  0x54   : > { %1177 = vmatpush3.bf16.msra.mxu0 %v1426_v52  ;;  %v1096_v52 = vld [vmem:[%s1923_s3 + $0x81] ss:$0 sm:$0xff] }
  0x55   : > { %1178 = vmatprep.subr.bf16.mxu0 %v1428_v54 }
  0x56   : > { %1287 = vmatpush3.bf16.msra.mxu1 %v1609_v7  ;;  %v1092_v7 = vld [vmem:[%s1923_s3 + $0x80] ss:$0 sm:$0xff] }
  0x57   : > { %1288 = vmatprep.subr.bf16.mxu1 %v1495_v1 }
  0x58   : > { %1179 = vmatpush3.bf16.msra.mxu0 %v1429_v55 }
  0x59   : > { %1180 = vmatprep.subr.bf16.mxu0 %v1431_v57 }
  0x5a   : > { %1289 = vmatpush3.bf16.msra.mxu1 %v1630_v10 }
  0x5b   : > { %1290 = vmatprep.subr.bf16.mxu1 %v1495_v1 }
  0x5c   : > { %1181 = vmatpush3.bf16.msra.mxu0 %v1432_v58 }
  0x5d   : > { %1318 = vmatprep.subr.mxu0 %v1495_v1 }
  0x5e   : > { %1291 = vmatpush3.bf16.msra.mxu1 %v1646_v13 }
  0x5f   : > { %1292 = vmatprep.subr.bf16.mxu1 %v1495_v1 }
  0x62   : > { %1293 = vmatpush3.bf16.msra.mxu1 %v1660_v20 }
  0x63   : > { %1298 = vmatprep.subr.bf16.mxu1 %v1495_v1 }
  0x65   : > { %1295 = vmatmul.mubr.msk.bf16.vlgmr.msra.gmra.mxu1 %vm277_vm2, %v573_v34  ;;  %v210_v34 = vld [vmem:[%s1923_s3 + $0x70] sm:$0xff] }
  0x66   : > { %1314 = vmatprep.mubr.msk.bf16.mxu1 %vm1496_vm1, %v1495_v1  ;;  %1299 = vmatpush3.bf16.msra.mxu1 %v1409_v35  ;;  %v209_v35 = vld [vmem:[%s1923_s3 + $0x68] sm:$0xff] }
  0x67   : > { %1300 = vmatprep.subr.bf16.mxu1 %v1495_v1 }
  0x6a   : > { %1301 = vmatpush3.bf16.msra.mxu1 %v1412_v38  ;;  %v206_v38 = vld [vmem:[%s1923_s3 + $0x50] sm:$0xff] }
  0x6b   : > { %1302 = vmatprep.subr.bf16.mxu1 %v1495_v1 }
  0x6e   : > { %1303 = vmatpush3.bf16.msra.mxu1 %v1415_v41  ;;  %v203_v41 = vld [vmem:[%s1923_s3 + $0x38] sm:$0xff] }
  0x6f   : > { %1304 = vmatprep.subr.bf16.mxu1 %v1495_v1 }
  0x72   : > { %1305 = vmatpush3.bf16.msra.mxu1 %v1418_v44  ;;  %v200_v44 = vld [vmem:[%s1923_s3 + $0x20] sm:$0xff] }
  0x73   : > { %1306 = vmatprep.subr.bf16.mxu1 %v1495_v1 }
  0x76   : > { %1307 = vmatpush3.bf16.msra.mxu1 %v1421_v48  ;;  %v196_v48 = vld [vmem:[%s1923_s3] sm:$0xff] }
  0x77   : > { %1308 = vmatprep.subr.bf16.mxu1 %v1495_v1 }
  0x7a   : > { %1309 = vmatpush3.bf16.msra.mxu1 %v1424_v51 }
  0x7b   : > { %1310 = vmatprep.subr.bf16.mxu1 %v1495_v1 }
  0x7e   : > { %1311 = vmatpush3.bf16.msra.mxu1 %v1427_v53 }
  0x7f   : > { %1312 = vmatprep.subr.bf16.mxu1 %v1495_v1 }
  0x82   : > { %1313 = vmatpush3.bf16.msra.mxu1 %v1430_v56 }
  0xe9   : > { %v319_v59 = vpop.f32.mrf.mxu1  ;;  %v473_v63 = vpop.f32.mrf.mxu0 }
  0xeb   : > { %v1226_v60 = vpop.f32.mrf.mxu1  ;;  %v1254_v0 = vpop.f32.mrf.mxu0 }
  0xed   : > { %v322_v61 = vpop.f32.mrf.mxu1  ;;  %v476_v2 = vpop.f32.mrf.mxu0 }
  0xef   : > { %v1227_v62 = vpop.f32.mrf.mxu1  ;;  %v1255_v3 = vpop.f32.mrf.mxu0 }
  0xfd   : > { %v392_v4 = vpop.f32.mrf.mxu1 }
  0xfe   : > { %v393_v5 = vadd.f32 %v392_v4, %v319_v59  ;;  %v214_v4 = vld [vmem:[%s1923_s3 + $0x82] sm:$0x1] }
  0xff   : > { %v1240_v6 = vpop.f32.mrf.mxu1  ;;  %v560_v12 = vpop.f32.mrf.mxu0 }
 0x100   : > { %v479_v8 = vadd.f32 %v473_v63, %v393_v5 }
 0x101   : > { %v395_v9 = vpop.f32.mrf.mxu1  ;;  %v1282_v14 = vpop.f32.mrf.mxu0 }
 0x102   : > { %v484_v10 = vadd.f32 %v1092_v7, %v479_v8 }
 0x103   : > { %v1241_v11 = vpop.f32.mrf.mxu1  ;;  %v563_v16 = vpop.f32.mrf.mxu0 }
 0x104   : > { %v485_v13 = vmax.f32 %v484_v10, 0.0 }
 0x105   : > { %v1283_v17 = vpop.f32.mrf.mxu0 }
 0x106   : > { %v626_v15 = vpack.c.bf16 %v485_v13, %v485_v13 }
 0x108   : > { %856 = vmatprep.mubr.bf16.mxu0 %v626_v15 }
 0x111   : > { %v520_v18 = vpop.f32.mrf.mxu1 }
 0x112   : > { %v561_v22 = vadd.f32 %v560_v12, %v520_v18 }
 0x113   : > { %v1268_v19 = vpop.f32.mrf.mxu1 }
 0x115   : > { %v523_v20 = vpop.f32.mrf.mxu1 }
 0x117   : > { %v1269_v21 = vpop.f32.mrf.mxu1 }
 0x125   : > { %v611_v23 = vpop.f32.mrf.mxu1 }
 0x126   : > { %v617_v24 = vadd.f32 %v611_v23, %v561_v22 }
 0x127   : > { %v1296_v25 = vpop.f32.mrf.mxu1 }
 0x128   : > { %v618_v26 = vadd.f32 %v1092_v7, %v617_v24 }
 0x129   : > { %v614_v27 = vpop.f32.mrf.mxu1 }
 0x12a   : > { %v619_v28 = vmax.f32 %v618_v26, 0.0 }
 0x12b   : > { %v1297_v29 = vpop.f32.mrf.mxu1 }
 0x12c   : > { %v621_v30 = vrot.slane %v619_v28, 7  ;;  %v627_v31 = vpack.c.bf16 %v619_v28, %v619_v28 }
 0x12e   : > { %v1124_v32 = vpack.c.bf16 %v621_v30, %v621_v30  ;;  %1315 = vmatmul.mubr.bf16.vlgmr.msra.gmra.mxu1 %v627_v31 }
 0x130   : > { %1125 = vmatmul.mubr.msk.bf16.vlgmr.msra.gmra.mxu0 %vm1123_vm5, %v1124_v32 }
 0x131   : > { %1319 = vmatpush3.msra.mxu0 %v211_v33  ;;  %1350 = vmatprep.mubr.msk.f32.mxu0 %vm1496_vm1, %v1495_v1 }
 0x132   : > { %1320 = vmatprep.subr.mxu0 %v1495_v1 }
 0x133   : > { %1321 = vmatpush3.msra.mxu0 %v210_v34 }
 0x134   : > { %1322 = vmatprep.subr.mxu0 %v1495_v1 }
 0x135   : > { %1323 = vmatpush3.msra.mxu0 %v209_v35 }
 0x136   : > { %1324 = vmatprep.subr.mxu0 %v1495_v1 }
 0x137   : > { %1325 = vmatpush3.msra.mxu0 %v208_v36 }
 0x138   : > { %1326 = vmatprep.subr.mxu0 %v1495_v1 }
 0x139   : > { %1327 = vmatpush3.msra.mxu0 %v207_v37 }
 0x13a   : > { %1328 = vmatprep.subr.mxu0 %v1495_v1 }
 0x13b   : > { %1329 = vmatpush3.msra.mxu0 %v206_v38 }
 0x13c   : > { %1330 = vmatprep.subr.mxu0 %v1495_v1 }
 0x13d   : > { %1331 = vmatpush3.msra.mxu0 %v205_v39 }
 0x13e   : > { %1332 = vmatprep.subr.mxu0 %v1495_v1 }
 0x13f   : > { %1333 = vmatpush3.msra.mxu0 %v204_v40 }
 0x140   : > { %1334 = vmatprep.subr.mxu0 %v1495_v1 }
 0x141   : > { %1335 = vmatpush3.msra.mxu0 %v203_v41 }
 0x142   : > { %1336 = vmatprep.subr.mxu0 %v1495_v1 }
 0x143   : > { %1337 = vmatpush3.msra.mxu0 %v202_v42 }
 0x144   : > { %1338 = vmatprep.subr.mxu0 %v1495_v1 }
 0x145   : > { %1339 = vmatpush3.msra.mxu0 %v201_v43 }
 0x146   : > { %1340 = vmatprep.subr.mxu0 %v1495_v1 }
 0x147   : > { %1341 = vmatpush3.msra.mxu0 %v200_v44 }
 0x148   : > { %1342 = vmatprep.subr.mxu0 %v1495_v1 }
 0x149   : > { %1343 = vmatpush3.msra.mxu0 %v199_v45 }
 0x14a   : > { %1344 = vmatprep.subr.mxu0 %v1495_v1 }
 0x14b   : > { %1345 = vmatpush3.msra.mxu0 %v198_v46 }
 0x14c   : > { %1346 = vmatprep.subr.mxu0 %v1495_v1 }
 0x14d   : > { %1347 = vmatpush3.msra.mxu0 %v197_v47 }
 0x14e   : > { %1348 = vmatprep.subr.mxu0 %v1495_v1 }
 0x14f   : > { %1349 = vmatpush3.msra.mxu0 %v196_v48 }
 0x1ee   : > { %v898_v49 = vpop.f32.mrf.mxu1 }
 0x1f0   : > { %v1182_v50 = vpop.f32.mrf.mxu0  ;;  %v1316_v51 = vpop.f32.mrf.mxu1 }
 0x1f2   : > { %v1183_v53 = vpop.f32.mrf.mxu0  ;;  %v901_v54 = vpop.f32.mrf.mxu1 }
 0x1f3   : > { %v1184_v55 = vadd.f32 %v1183_v53, %v1182_v50 }
 0x1f4   : > { %v1185_v56 = vpop.f32.mrf.mxu0  ;;  %v1317_v57 = vpop.f32.mrf.mxu1 }
 0x1f5   : > { %v859_v58 = vadd.f32 %v1184_v55, %v1096_v52 }
 0x1f6   : > { %v1186_v59 = vpop.f32.mrf.mxu0 }
 0x1f7   : > { %v899_v60 = vadd.f32 %v898_v49, %v859_v58 }
 0x1f9   : > { %v904_v61 = vmax.f32 %v899_v60, 0.0 }
 0x1fb   : > { %v905_v1 = vrot.slane %v904_v61, 4 }
 0x1fd   : > { %v906_v62 = vadd.f32 %v905_v1, %v904_v61 }
 0x1ff   : > { %v907_v63 = vrot.slane %v906_v62, 2 }
 0x201   : > { %v908_v0 = vadd.f32 %v907_v63, %v906_v62 }
 0x203   : > { %v909_v2 = vrot.slane %v908_v0, 1 }
 0x205   : > { %v910_v3 = vadd.f32 %v909_v2, %v908_v0 }
 0x207   : > { %1351 = vmatmul.mubr.f32.vlgmr.msra.gmra.mxu0 %v910_v3 }
 0x2c7   : > { %v977_v5 = vpop.f32.mrf.mxu0 }
 0x2c8   : > { %v978_v6 = vadd.f32 %v977_v5, %v214_v4 }
 0x2c9   : > { %v1352_v7 = vpop.f32.mrf.mxu0 }
 0x2ca   : > { %981 = vst [vmem:[%s189_s5] sm:$0x1] %v978_v6 }
 0x2cb   : > { %1446 = shalt.err (!%p1443_p3)
}
 0x2cc   : > { %s1447_s14 = scalar_lea.hbm %s1885_s9, 16  ;;  %s1451_s27 = scalar_lea.hbm %s1924_s4, 32 }
 0x2cd   : > { %p1448_p4 = scmp.ne.s32.totalorder %s1885_s9, %s1447_s14  ;;  %p1452_p9 = scmp.lt.s32.totalorder %s1885_s9, %s1924_s4 }
 0x2ce   : > { %p1453_p10 = scmp.lt.s32.totalorder %s1451_s27, %s1447_s14 }
 0x2cf   : > { %p1449_p7 = pnand %p1448_p4, %p1561_p5 }
 0x2d0   : > { %p1454_p11 = por %p1453_p10, %p1452_p9 }
 0x2d1   : > { %p1450_p8 = pneg %p1449_p7 }
 0x2d3   : > { %p1455_p12 = pnand %p1454_p11, %p1450_p8 }
 0x2d5   : > { %1458 = shalt.err (!%p1455_p12)
}
 0x2d6   : > { %1353 = dma.vmem_to_hbm [thread:$0]  (%p1561_p5), %s996_s6, 16, %s1885_s9, %s983_s10  }
 0x2d7 PF: > { %p1359_p13 = scmp.ge.s32.totalorder %s1493_s18, 2  ;;  %s1007_s29 = sand.u32 1, %s1481_s15  }
 0x2d8   : > { %s1008_s30 = scalar_lea.sflag [#allocation3], %s1007_s29 }
 0x2d9   : > { %p1356_p0 = pnand %p1359_p13, %p1565_p6 }
 0x2db   : > { %p1357_p1 = pneg %p1356_p0 }
 0x2dd   : > { %1476 = dma.done.wait (%p1357_p1), %s1008_s30, 16  }
 0x2de   : > { %1478 = vsyncadd (%p1357_p1), %s1008_s30, 4294967280  ;;  %p14_p2 = scmp.ge.s32.totalorder %s1548_s21, 4   ;;  %s1927_s15 = smov %s1485_s16 }
 0x2df   : > { %s1928_s16 = smov %s1489_s17  ;;  %s1929_s17 = smov %s1559_s24 }
 0x2e0   : > { %s1930_s18 = smov %s1548_s21  ;;  %16 = sbr.rel (!%p14_p2) target bundleno = 3 (0x3), region = 73 }
 0x2e5   :  { %1012 = vsyncpa [#allocation3], 1 }
 0x2e6   :  { %1014 = vsyncpa [#allocation3 + $0x1], 1 }

</bundles_post_ra>
